<compile_context>
chip_gen: v6e
topology: v6e:2x2x1
jax: 0.10.0
libtpu: 0.0.40
codegen_flags: <defaults>
</compile_context>

<pallas_src>
import functools

import jax
import jax.numpy as jnp
from jax.experimental import pallas as pl
from jax.experimental.pallas import tpu as pltpu


# ----------------------------------------------------------------------------
# Kernels
# ----------------------------------------------------------------------------
def _head_kernel_hw_tiled(x_ref, w_ref, o_ref, *, relu):
    # x_ref: (1, Cin, T_HW)   w_ref: (Cout, Cin)   o_ref: (1, Cout, T_HW)
    y = jnp.dot(w_ref[...], x_ref[0], preferred_element_type=jnp.float32)
    if relu:
        y = jnp.maximum(y, 0.0)
    o_ref[0] = y.astype(o_ref.dtype)


def _head_kernel_batched(x_ref, w_ref, o_ref, *, relu, flat):
    # x_ref: (T_N, Cin, HW)   w_ref: (Cout, Cin)
    # o_ref: (T_N, 1, Cout*HW) if flat else (T_N, Cout, HW)
    t_n = x_ref.shape[0]
    for n in range(t_n):  # static unroll; T_N is capped small (<= 32)
        y = jnp.dot(w_ref[...], x_ref[n], preferred_element_type=jnp.float32)
        if relu:
            y = jnp.maximum(y, 0.0)
        y = y.astype(o_ref.dtype)
        if flat:
            # Lane-dense store: (Cout, HW) -> (Cout*HW,).  Cout*HW is the
            # contiguous NCHW layout, so the wrapper reshape is exact.
            o_ref[n, 0, :] = y.reshape(-1)
        else:
            o_ref[n] = y


# ----------------------------------------------------------------------------
# Sizing helpers
# ----------------------------------------------------------------------------
def _vmem_budgets():
    """(vmem_limit_bytes, tile_budget_bytes) chosen per chip generation."""
    try:
        cap = int(pltpu.get_tpu_info().vmem_capacity_bytes)
    except Exception:
        cap = 128 * 1024 * 1024
    if cap >= 128 * 1024 * 1024:          # v5e / v6e: 128 MiB physical VMEM
        return 64 * 1024 * 1024, 24 * 1024 * 1024
    else:                                  # v7x: 64 MiB physical VMEM
        return 48 * 1024 * 1024, 16 * 1024 * 1024


def _choose_hw_tile(hw, cin, cout, itemsize, tile_budget):
    """Largest lane-dense (multiple-of-128) HW tile whose double-buffered
    x/out blocks fit the per-generation tile budget."""
    t = 8192
    while t > 128 and 2 * t * (cin + cout) * itemsize > tile_budget:
        t //= 2
    return t


# ----------------------------------------------------------------------------
# Wrapper
# ----------------------------------------------------------------------------
def head_forward(x_nchw: jax.Array, weight: jax.Array, activation: str = "None"):
    """Equivalent of Head.forward.

    x_nchw : (N, Cin, H, W)       (PyTorch NCHW layout)
    weight : (Cout, Cin, 1, 1)    (PyTorch Conv2d weight layout)
    """
    assert activation in ("None", "relu")
    relu = activation == "relu"
    N, Cin, H, W = x_nchw.shape
    Cout = weight.shape[0]
    HW = H * W
    out_dtype = x_nchw.dtype

    # No transposes: NCHW viewed as (N, Cin, HW); conv weight is (Cout, Cin).
    x_resh = x_nchw.reshape(N, Cin, HW)
    w_mat = weight.reshape(Cout, Cin)

    itemsize = jnp.dtype(x_resh.dtype).itemsize
    vmem_limit, tile_budget = _vmem_budgets()
    t_hw = _choose_hw_tile(HW, Cin, Cout, itemsize, tile_budget)

    cost = pl.CostEstimate(
        flops=2 * N * HW * Cin * Cout,
        transcendentals=0,
        bytes_accessed=(x_resh.size + w_mat.size + N * Cout * HW) * itemsize,
    )

    # ------------------------------------------------------------------
    # Regime B: large feature maps — tile the spatial axis per image.
    # Also used for N == 1 with HW >= 256 so that a v7x chip's second
    # TensorCore gets a grid step.
    # ------------------------------------------------------------------
    if HW > t_hw or (N == 1 and HW >= 256):
        if HW <= t_hw:  # N == 1: split HW into two 128-multiple tiles
            t_hw = max(128, ((pl.cdiv(HW, 2) + 127) // 128) * 128)
        grid = (N, pl.cdiv(HW, t_hw))
        kernel = functools.partial(_head_kernel_hw_tiled, relu=relu)
        out = pl.pallas_call(
            kernel,
            out_shape=jax.ShapeDtypeStruct((N, Cout, HW), out_dtype),
            grid_spec=pltpu.PrefetchScalarGridSpec(
                num_scalar_prefetch=0,
                grid=grid,
                in_specs=[
                    # One image, full channel extent, lane-dense HW tile.
                    pl.BlockSpec((1, Cin, t_hw), lambda n, j: (n, 0, j)),
                    # Weight: constant block index -> stays resident in VMEM.
                    pl.BlockSpec((Cout, Cin), lambda n, j: (0, 0)),
                ],
                out_specs=pl.BlockSpec((1, Cout, t_hw), lambda n, j: (n, 0, j)),
            ),
            compiler_params=pltpu.CompilerParams(
                dimension_semantics=("parallel", "parallel"),
                vmem_limit_bytes=vmem_limit,
            ),
            cost_estimate=cost,
        )(x_resh, w_mat)
        return out.reshape(N, Cout, H, W)

    # ------------------------------------------------------------------
    # Regime A: whole feature map per image fits one tile — batch T_N
    # images per grid step to amortize per-step overhead / enlarge DMAs.
    # ------------------------------------------------------------------
    per_image_bytes = 2 * (Cin + Cout) * HW * itemsize  # double-buffered in+out
    t_n = max(1, min(tile_budget // max(per_image_bytes, 1), 32))
    if N >= 2:
        t_n = min(t_n, pl.cdiv(N, 2))  # keep >= 2 grid steps (v7x 2 TCs)
    t_n = min(t_n, N)
    grid = (pl.cdiv(N, t_n),)

    flat = (HW % 128) != 0  # HW not lane-dense -> store a (Cout*HW,) slab
    kernel = functools.partial(_head_kernel_batched, relu=relu, flat=flat)
    if flat:
        out_shape = jax.ShapeDtypeStruct((N, 1, Cout * HW), out_dtype)
        out_spec = pl.BlockSpec((t_n, 1, Cout * HW), lambda i: (i, 0, 0))
    else:
        out_shape = jax.ShapeDtypeStruct((N, Cout, HW), out_dtype)
        out_spec = pl.BlockSpec((t_n, Cout, HW), lambda i: (i, 0, 0))

    out = pl.pallas_call(
        kernel,
        out_shape=out_shape,
        grid_spec=pltpu.PrefetchScalarGridSpec(
            num_scalar_prefetch=0,
            grid=grid,
            in_specs=[
                pl.BlockSpec((t_n, Cin, HW), lambda i: (i, 0, 0)),
                pl.BlockSpec((Cout, Cin), lambda i: (0, 0)),
            ],
            out_specs=out_spec,
        ),
        compiler_params=pltpu.CompilerParams(
            dimension_semantics=("parallel",),
            vmem_limit_bytes=vmem_limit,
        ),
        cost_estimate=cost,
    )(x_resh, w_mat)
    return out.reshape(N, Cout, H, W)


# ----------------------------------------------------------------------------
# Self-test
# ----------------------------------------------------------------------------
def _quantize(a, scale):
    # Snap values to a grid exactly representable in bf16 so MXU precision
    # choices cannot affect the comparison against the f32 reference.
    return jnp.round(a * scale) / scale


if __name__ == "__main__":
    key = jax.random.PRNGKey(0)
    k_x, k_w, k_x2, k_w2, k_x3, k_w3 = jax.random.split(key, 6)
    hi = jax.lax.Precision.HIGHEST

    # 1) Regime A (batched images, HW multiple of 128), ReLU head.
    N, Cin, H, W, Cout = 2, 4, 16, 16, 8
    x = _quantize(jax.random.normal(k_x, (N, Cin, H, W), dtype=jnp.float32), 8.0)
    w = _quantize(jax.random.normal(k_w, (Cout, Cin, 1, 1), dtype=jnp.float32), 8.0) * 0.25
    out = jax.block_until_ready(head_forward(x, w, activation="relu"))
    ref = jnp.maximum(
        jnp.einsum("nchw,oc->nohw", x, w.reshape(Cout, Cin), precision=hi), 0.0)
    assert out.shape == (N, Cout, H, W)
    assert jnp.allclose(out, ref, atol=1e-5, rtol=1e-5)

    # 2) Regime A with HW < 128 -> lane-dense flat-slab output, Identity head.
    #    (N=3 with T_N=2 also exercises the clipped last block.)
    N2, Cin2, H2, W2, Cout2 = 3, 4, 8, 8, 2
    x2 = _quantize(jax.random.normal(k_x2, (N2, Cin2, H2, W2), dtype=jnp.float32), 8.0)
    w2 = _quantize(jax.random.normal(k_w2, (Cout2, Cin2, 1, 1), dtype=jnp.float32), 8.0) * 0.25
    out2 = jax.block_until_ready(head_forward(x2, w2, activation="None"))
    ref2 = jnp.einsum("nchw,oc->nohw", x2, w2.reshape(Cout2, Cin2), precision=hi)
    assert out2.shape == (N2, Cout2, H2, W2)
    assert jnp.allclose(out2, ref2, atol=1e-5, rtol=1e-5)

    # 3) Regime B path: N == 1 with HW >= 256 splits the spatial axis so both
    #    v7x TensorCores get work.
    N3, Cin3, H3, W3, Cout3 = 1, 4, 16, 16, 8
    x3 = _quantize(jax.random.normal(k_x3, (N3, Cin3, H3, W3), dtype=jnp.float32), 8.0)
    w3 = _quantize(jax.random.normal(k_w3, (Cout3, Cin3, 1, 1), dtype=jnp.float32), 8.0) * 0.25
    out3 = jax.block_until_ready(head_forward(x3, w3, activation="relu"))
    ref3 = jnp.maximum(
        jnp.einsum("nchw,oc->nohw", x3, w3.reshape(Cout3, Cin3), precision=hi), 0.0)
    assert out3.shape == (N3, Cout3, H3, W3)
    assert jnp.allclose(out3, ref3, atol=1e-5, rtol=1e-5)

    print("KERNEL_OK")
</pallas_src>

<mosaic_0001>
module attributes {stable_mosaic.version = 11 : i64} {
  func.func @_head_kernel_batched(%arg0: i32, %arg1: memref<1x4x256xf32, #tpu.memory_space<vmem>>, %arg2: memref<8x4xf32, #tpu.memory_space<vmem>>, %arg3: memref<1x8x256xf32, #tpu.memory_space<vmem>>) attributes {dimension_semantics = [#tpu.dimension_semantics<parallel>], iteration_bounds = array<i64: 2>, scalar_prefetch = 0 : i64, scratch_operands = 0 : i64, tpu.core_type = #tpu.core_type<tc>, window_params = [{transform_indices = @transform_0, window_bounds = array<i64: 1, 4, 256>}, {pipeline_mode = #tpu.pipeline_mode<synchronous>, transform_indices = @transform_1, window_bounds = array<i64: 8, 4>}, {transform_indices = @transform_2, window_bounds = array<i64: 1, 8, 256>}]} {
    %c0 = arith.constant 0 : index
    %c0_0 = arith.constant 0 : index
    %0 = vector.load %arg2[%c0, %c0_0] : memref<8x4xf32, #tpu.memory_space<vmem>>, vector<8x4xf32>
    %c0_1 = arith.constant 0 : index
    %c0_2 = arith.constant 0 : index
    %c0_3 = arith.constant 0 : index
    %1 = vector.load %arg1[%c0_1, %c0_2, %c0_3] : memref<1x4x256xf32, #tpu.memory_space<vmem>>, vector<1x4x256xf32>
    %2 = vector.shape_cast %1 : vector<1x4x256xf32> to vector<4x256xf32>
    %cst = arith.constant dense<0.000000e+00> : vector<8x256xf32>
    %3 = tpu.matmul %0, %2, %cst {dimension_numbers = #tpu.dot_dimension_numbers<[1], [0], [0], [1], [0, 0, 1, 1], [], []>} : vector<8x4xf32>, vector<4x256xf32>, vector<8x256xf32> -> vector<8x256xf32>
    %cst_4 = arith.constant 0.000000e+00 : f32
    %4 = vector.broadcast %cst_4 : f32 to vector<8x256xf32>
    %5 = arith.maximumf %3, %4 : vector<8x256xf32>
    %c0_5 = arith.constant 0 : index
    %c0_6 = arith.constant 0 : index
    %c0_7 = arith.constant 0 : index
    %6 = vector.load %arg3[%c0_5, %c0_6, %c0_7] : memref<1x8x256xf32, #tpu.memory_space<vmem>>, vector<1x8x256xf32>
    %7 = vector.shape_cast %6 : vector<1x8x256xf32> to vector<8x256xf32>
    %8 = vector.shape_cast %5 : vector<8x256xf32> to vector<1x8x256xf32>
    tpu.vector_store %arg3[%c0_5, %c0_6, %c0_7], %8 {strides = array<i32>} : memref<1x8x256xf32, #tpu.memory_space<vmem>>, vector<1x8x256xf32>,
    return
  }
  func.func @transform_0(%arg0: i32) -> (i32, i32, i32) {
    %c0_i32 = arith.constant 0 : i32
    %c0_i32_0 = arith.constant 0 : i32
    %c0_i32_1 = arith.constant 0 : i32
    return %arg0, %c0_i32, %c0_i32_0 : i32, i32, i32
  }
  func.func @transform_1(%arg0: i32) -> (i32, i32) {
    %c0_i32 = arith.constant 0 : i32
    %c0_i32_0 = arith.constant 0 : i32
    %c0_i32_1 = arith.constant 0 : i32
    return %c0_i32, %c0_i32_0 : i32, i32
  }
  func.func @transform_2(%arg0: i32) -> (i32, i32, i32) {
    %c0_i32 = arith.constant 0 : i32
    %c0_i32_0 = arith.constant 0 : i32
    %c0_i32_1 = arith.constant 0 : i32
    return %arg0, %c0_i32, %c0_i32_0 : i32, i32, i32
  }
}

</mosaic_0001>

<bundles_post_ra>
// kernel: tpu_custom_call.1
= control target key start
LH: loop header
LB: loop body
LE: loop exit
PB: predicated region body
PF: predicated region fallthrough
CT: control target
= control target key end

     0   :  { %7 = vsyncpa [#allocation3], 0  ;;  %s657_s0 = inlined_call_operand.hbm [shape: f32[2,4,256], index: 0, kind: input, shape index: {}]   ;;  %s658_s1 = inlined_call_operand.vmem [shape: f32[8,4], index: 1, kind: input, shape index: {}]   ;;  %s659_s2 = inlined_call_operand.hbm [shape: f32[2,8,256], index: 2, kind: output, shape index: {}]  }
   0x1   :  { %9 = vsyncpa [#allocation3 + $0x1], 0 }
   0x2   :  { %10 = vsyncpa [#allocation4], 0 }
   0x3   :  { %12 = vsyncpa [#allocation4 + $0x1], 0  ;;  %s512_s9 = smov 0   ;;  %s514_s10 = smov 0  }
   0x4   :  { %s516_s11 = smov 0   ;;  %s518_s12 = smov 0  }
   0x5 LB: > { %s533_s13 = sadd.s32 4294967295, %s492_s12   ;;  %s333_s14 = sadd.s32 4294967294, %s492_s12   ;;  %s492_s12 = sphi %s518_s12, %s676_s12   ;;  %s488_s11 = sphi %s516_s11, %s675_s11   ;;  %s484_s10 = sphi %s514_s10, %s674_s10   ;;  %s480_s9 = sphi %s512_s9, %s673_s9  }
   0x6   : > { %s537_s15 = sadd.s32 1, %s492_s12   ;;  %s25_s16 = sadd.s32 1, %s488_s11 }
   0x7   : > { %s22_s17 = ssub.s32 %s492_s12, %s537_s15  ;;  %p32_p0 = scmp.ne.s32.totalorder %s488_s11, %s484_s10 }
   0x8   : > { %p23_p1 = scmp.eq.s32.totalorder %s22_s17, 0  ;;  %p33_p2 = scmp.eq.s32.totalorder %s492_s12, 0 }
   0x9   : > { %p38_p3 = scmp.ne.s32.totalorder %s484_s10, %s480_s9  ;;  %p39_p4 = scmp.eq.s32.totalorder %s533_s13, 0 }
   0xa   : > { %s549_s18 = scalar_select %p23_p1, %s488_s11, %s25_s16  }
   0xb   : > { %p551_p5 = por %p33_p2, %p32_p0  ;;  %p555_p6 = por %p39_p4, %p38_p3 }
   0xc   : > { %p83_p7 = scmp.eq.s32.totalorder %s533_s13, 1  ;;  %p89_p8 = scmp.eq.s32.totalorder %s333_s14, 1 }
   0xd   : > { %s663_s20 = scalar_select %p555_p6, 1, 0 }
   0xe   : > { %p364_p10 = scmp.lt.s32.totalorder %s492_s12, 2  ;;  %p562_p11 = por %p83_p7, %p32_p0 }
   0xf   : > { %p566_p12 = por %p89_p8, %p38_p3  ;;  %s112_s23 = sand.u32 1, %s488_s11  }
  0x10   : > { %s664_s21 = scalar_select %p562_p11, 1, 0 }
  0x11   : > { %s665_s22 = scalar_select %p566_p12, 1, 0 }
  0x12   : > { %s350_s24 = sshll.u32 %s492_s12, 7  ;;  %s336_s25 = sshll.u32 %s112_s23, 3 }
  0x13   : > { %s575_s28 = scalar_lea.hbm %s657_s0, %s350_s24  ;;  %s116_s29 = scalar_lea.vmem [#allocation2], %s336_s25 }
  0x14   : > { %s124_s30 = sshll.u32 %s116_s29, 4  ;;  %p579_p13 = pnand %p364_p10, %p551_p5  ;;  %s583_s30 = int_to_ptr.vmem [resolvable:$true] %s124_s30 }
  0x15   : > { %s113_s4 = scalar_lea.sflag [#allocation3], %s112_s23  ;;  %s400_s5 = scalar_lea.hbm %s575_s28, 128 }
  0x16   : > { %p401_p2 = scmp.ne.s32.totalorder %s575_s28, %s400_s5  ;;  %p402_p3 = pneg %p579_p13 }
  0x17   : > { %s405_s8 = scalar_lea.hbm %s657_s0, 256  ;;  %p406_p5 = scmp.lt.s32.totalorder %s575_s28, %s657_s0 }
  0x18   : > { %p403_p4 = pnand %p402_p3, %p401_p2  ;;  %p407_p8 = scmp.lt.s32.totalorder %s405_s8, %s400_s5 }
  0x1a   : > { %p404_p7 = pneg %p403_p4  ;;  %p408_p10 = por %p407_p8, %p406_p5 }
  0x1c   : > { %p409_p9 = pnand %p408_p10, %p404_p7 }
  0x1e   : > { %412 = shalt.err (!%p409_p9)
}
  0x1f   : > { %s413_s17 = scalar_lea.vmem %s583_s30, 128  ;;  %s494_s19 = smov [#allocation2]  }
  0x20   : > { %p414_p0 = scmp.ne.s32.totalorder %s583_s30, %s413_s17  ;;  %s418_s23 = sshll.u32 %s494_s19, 4  ;;  %s419_s23 = int_to_ptr.vmem [resolvable:$false] %s418_s23 }
  0x21   : > { %s420_s24 = scalar_lea.vmem %s419_s23, 256  ;;  %p421_p4 = scmp.lt.s32.totalorder %s583_s30, %s419_s23 }
  0x22   : > { %p416_p1 = pnand %p414_p0, %p402_p3  ;;  %p422_p12 = scmp.lt.s32.totalorder %s420_s24, %s413_s17 }
  0x24   : > { %p417_p2 = pneg %p416_p1  ;;  %p423_p11 = por %p422_p12, %p421_p4 }
  0x26   : > { %p424_p6 = pnand %p423_p11, %p417_p2 }
  0x28   : > { %427 = shalt.err (!%p424_p6)
}
  0x29   : > { %359 = dma.hbm_to_vmem [thread:$0]  (!%p579_p13), %s575_s28, 128, %s583_s30, %s113_s4  }
  0x2a   : > { %p667_p9 = scmp.lt.s32.totalorder %s492_s12, 3  ;;  %p668_p7 = scmp.ge.s32.totalorder %s492_s12, 1 }
  0x2c   : > { %p130_p0 = pnand %p668_p7, %p667_p9 }
  0x2d   : > { %s610_s25 = sand.u32 (!%p130_p0), 1, %s484_s10   ;;  %p669_p6 = scmp.ne.s32.totalorder (!%p130_p0), %s663_s20, 0 }
  0x2e   : > { %133 = sbr.rel (%p130_p0) target bundleno = 267 (0x10b), region = 28  ;;  %s340_s26 = sshll.u32 (!%p130_p0), %s610_s25, 3 }
  0x2f   : > { %s136_s27 = scalar_lea.sflag (!%p130_p0), [#allocation3], %s610_s25  ;;  %s139_s29 = scalar_lea.vmem (!%p130_p0), [#allocation2], %s340_s26 }
  0x33   : > { %471 = dma.done.wait (%p669_p6), %s136_s27, 128  }
  0x34   : > { %473 = vsyncadd (%p669_p6), %s136_s27, 4294967168  ;;  %v495_v0 = vmov 0.0   ;;  %v161_v1 = vld [vmem:[%s139_s29] sm:$0xff]  ;;  %vm168_vm0 = vcmask 1043456   ;;  %vm164_vm1 = vcmask 31744   ;;  %s341_s3 = sshll.u32 %s610_s25, 4 }
  0x35   : > { %237 = vmatprep.mubr.f32.mxu0 %v495_v0  ;;  %v163_v2 = vcombine.high %v161_v1, %v161_v1  ;;  %v160_v3 = vld [vmem:[%s658_s1] sm:$0xff]  ;;  %s351_s20 = sshll.u32 %s533_s13, 8  ;;  %s159_s4 = scalar_lea.vmem [#allocation5], %s341_s3 }
  0x36   : > { %s263_s5 = sshll.u32 %s159_s4, 4  ;;  %s261_s8 = scalar_lea.hbm %s659_s2, %s351_s20  ;;  %s264_s5 = int_to_ptr.vmem [resolvable:$true] %s263_s5 }
  0x37   : > { %342 = vmatprep.subr.msk.mxu0 %vm168_vm0, %v163_v2  ;;  %s249_s14 = scalar_lea.sflag [#allocation4], %s610_s25  ;;  %s428_s16 = scalar_lea.vmem %s264_s5, 256 }
  0x38   : > { %343 = vmatpush1.msk.msra.mxu0 %vm168_vm0, %v161_v1  ;;  %p429_p11 = scmp.ne.s32.totalorder %s264_s5, %s428_s16  ;;  %p670_p12 = scmp.ne.s32.totalorder %s664_s21, 0 }
  0x39   : > { %344 = vmatmul.mubr.msk.f32.vlgmr.msra.gmra.mxu0 %vm164_vm1, %v160_v3  ;;  %s496_s17 = smov [#allocation5]  }
  0x3a   : > { %p430_p13 = pnand %p429_p11, %p670_p12  ;;  %s432_s13 = sshll.u32 %s496_s17, 4  ;;  %s433_s13 = int_to_ptr.vmem [resolvable:$false] %s432_s13 }
  0x3b   : > { %s434_s19 = scalar_lea.vmem %s433_s13, 512  ;;  %p435_p3 = scmp.lt.s32.totalorder %s264_s5, %s433_s13 }
  0x3c   : > { %p431_p1 = pneg %p430_p13  ;;  %p436_p5 = scmp.lt.s32.totalorder %s434_s19, %s428_s16 }
  0x3e   : > { %p437_p8 = por %p436_p5, %p435_p3 }
  0x40   : > { %p438_p10 = pnand %p437_p8, %p431_p1 }
  0xf9   : > { %v239_v4 = vpop.f32.mrf.mxu0 }
  0xfa   : > { %v244_v5 = vmax.f32 %v239_v4, 0.0 }
  0xfb   : > { %v241_v6 = vpop.f32.mrf.mxu0 }
  0xfc   : > { %246 = vst [vmem:[%s159_s4] sm:$0xff] %v244_v5  ;;  %v245_v7 = vmax.f32 %v241_v6, 0.0 }
  0xfe   : > { %247 = vst [vmem:[%s159_s4 + $0x8] sm:$0xff] %v245_v7 }
  0xff   : > { %441 = shalt.err (!%p438_p10)
}
 0x100   : > { %s442_s23 = scalar_lea.hbm %s261_s8, 256  ;;  %s446_s26 = scalar_lea.hbm %s659_s2, 512 }
 0x101   : > { %p443_p2 = scmp.ne.s32.totalorder %s261_s8, %s442_s23  ;;  %p447_p7 = scmp.lt.s32.totalorder %s261_s8, %s659_s2 }
 0x102   : > { %p448_p0 = scmp.lt.s32.totalorder %s446_s26, %s442_s23 }
 0x103   : > { %p444_p4 = pnand %p443_p2, %p670_p12 }
 0x104   : > { %p449_p6 = por %p448_p0, %p447_p7 }
 0x105   : > { %p445_p9 = pneg %p444_p4 }
 0x107   : > { %p450_p11 = pnand %p449_p6, %p445_p9 }
 0x109   : > { %453 = shalt.err (!%p450_p11)
}
 0x10a   : > { %354 = dma.vmem_to_hbm [thread:$0]  (%p670_p12), %s264_s5, 256, %s261_s8, %s249_s14  }
 0x10b PF: > { %s275_s28 = sand.u32 1, %s480_s9   ;;  %p671_p13 = scmp.ne.s32.totalorder %s665_s22, 0 }
 0x10c   : > { %p672_p1 = scmp.ge.s32.totalorder %s492_s12, 2  ;;  %s276_s30 = scalar_lea.sflag [#allocation4], %s275_s28 }
 0x10e   : > { %p361_p3 = pnand %p672_p1, %p671_p13 }
 0x110   : > { %p362_p5 = pneg %p361_p3 }
 0x112   : > { %475 = dma.done.wait (%p362_p5), %s276_s30, 256  }
 0x113   : > { %477 = vsyncadd (%p362_p5), %s276_s30, 4294967040  ;;  %p15_p8 = scmp.ge.s32.totalorder %s537_s15, 4   ;;  %s673_s9 = smov %s484_s10 }
 0x114   : > { %s674_s10 = smov %s488_s11  ;;  %s675_s11 = smov %s549_s18 }
 0x115   : > { %s676_s12 = smov %s537_s15  ;;  %17 = sbr.rel (!%p15_p8) target bundleno = 5 (0x5), region = 73 }
 0x11a   :  { %281 = vsyncpa [#allocation3], 1 }
 0x11b   :  { %283 = vsyncpa [#allocation3 + $0x1], 1 }
 0x11c   :  { %284 = vsyncpa [#allocation4], 1 }
 0x11d   :  { %286 = vsyncpa [#allocation4 + $0x1], 1 }

</bundles_post_ra>
